<compile_context>
chip_gen: v6e
topology: v6e:2x2x1
jax: 0.10.0
libtpu: 0.0.40
codegen_flags: <defaults>
</compile_context>

<pallas_src>
import math

import jax
import jax.numpy as jnp
from jax.experimental import pallas as pl
from jax.experimental.pallas import tpu as pltpu

INPUT_SIZE = 11
LAYER1 = 32
LAYER2 = 64
OUTPUT_SIZE = 6


def dqn_mlp_kernel(x_ref, w1_ref, b1_ref, w2_ref, b2_ref, w3_ref, b3_ref, o_ref):
    # x_ref: (11, TILE_B) bf16; weights (out, in) bf16; biases (out, 1) f32.
    # Three fused MXU matmuls with f32 accumulation, bias-add + ReLU on the
    # VPU in f32, lane-dense (6, TILE_B) f32 output store.
    x = x_ref[...]                                                     # (11, TB)

    h1 = jnp.dot(w1_ref[...], x, preferred_element_type=jnp.float32)  # (32, TB) f32
    h1 = jnp.maximum(h1 + b1_ref[...], 0.0)

    h2 = jnp.dot(w2_ref[...], h1.astype(w2_ref.dtype),
                 preferred_element_type=jnp.float32)                   # (64, TB) f32
    h2 = jnp.maximum(h2 + b2_ref[...], 0.0)

    out = jnp.dot(w3_ref[...], h2.astype(w3_ref.dtype),
                  preferred_element_type=jnp.float32)                  # (6, TB) f32
    o_ref[...] = (out + b3_ref[...]).astype(o_ref.dtype)


def dqn_forward(x, params, *, tile_b=2048, compute_dtype=jnp.bfloat16):
    """x: (B, 11) float32; params: dict with w1,w2,w3 (out, in) and b1,b2,b3 (out, 1)."""
    B = x.shape[0]
    cdt = compute_dtype
    cbytes = jnp.dtype(cdt).itemsize

    # Tile size: multiple of 128 lanes, no larger than the (128-rounded) batch.
    min_pad = pl.cdiv(B, 128) * 128
    tile_b = min(pl.cdiv(tile_b, 128) * 128, min_pad)
    padded_B = pl.cdiv(B, tile_b) * tile_b

    # Pad batch to a multiple of tile_b, cast the HBM-resident stream to bf16,
    # and flip to batch-on-lanes layout (features on sublanes).
    xp = x
    if padded_B != B:
        xp = jnp.pad(x, ((0, padded_B - B), (0, 0)))
    x_t = xp.astype(cdt).T                                             # (11, padded_B)

    w1 = params["w1"].astype(cdt)   # (32, 11)
    w2 = params["w2"].astype(cdt)   # (64, 32)
    w3 = params["w3"].astype(cdt)   # (6, 64)
    b1 = params["b1"]               # (32, 1) f32
    b2 = params["b2"]               # (64, 1) f32
    b3 = params["b3"]               # (6, 1)  f32

    grid = (padded_B // tile_b,)
    const = lambda shape: pl.BlockSpec(shape, lambda i: (0, 0))        # VMEM-resident

    weight_bytes = (w1.size + w2.size + w3.size) * cbytes + (b1.size + b2.size + b3.size) * 4
    cost = pl.CostEstimate(
        flops=2 * padded_B * (INPUT_SIZE * LAYER1 + LAYER1 * LAYER2 + LAYER2 * OUTPUT_SIZE),
        transcendentals=0,
        bytes_accessed=padded_B * (INPUT_SIZE * cbytes + OUTPUT_SIZE * 4) + weight_bytes,
    )

    out_t = pl.pallas_call(
        dqn_mlp_kernel,
        out_shape=jax.ShapeDtypeStruct((OUTPUT_SIZE, padded_B), jnp.float32),
        grid=grid,
        in_specs=[
            pl.BlockSpec((INPUT_SIZE, tile_b), lambda i: (0, i)),      # x tile (batch on lanes)
            const(w1.shape), const(b1.shape),
            const(w2.shape), const(b2.shape),
            const(w3.shape), const(b3.shape),
        ],
        out_specs=pl.BlockSpec((OUTPUT_SIZE, tile_b), lambda i: (0, i)),
        compiler_params=pltpu.CompilerParams(
            dimension_semantics=("parallel",),
        ),
        cost_estimate=cost,
    )(x_t, w1, b1, w2, b2, w3, b3)

    return out_t.T[:B]                                                 # (B, 6) f32


def init_params(key):
    """PyTorch nn.Linear default init: U(-1/sqrt(fan_in), 1/sqrt(fan_in)); W is (out, in)."""
    def linear(key, fan_in, fan_out):
        kw, kb = jax.random.split(key)
        bound = 1.0 / math.sqrt(fan_in)
        w = jax.random.uniform(kw, (fan_out, fan_in), jnp.float32, -bound, bound)
        b = jax.random.uniform(kb, (fan_out, 1), jnp.float32, -bound, bound)
        return w, b

    k1, k2, k3 = jax.random.split(key, 3)
    w1, b1 = linear(k1, INPUT_SIZE, LAYER1)
    w2, b2 = linear(k2, LAYER1, LAYER2)
    w3, b3 = linear(k3, LAYER2, OUTPUT_SIZE)
    return dict(w1=w1, b1=b1, w2=w2, b2=b2, w3=w3, b3=b3)


def reference_forward(x, p, compute_dtype=jnp.bfloat16):
    """Pure-JAX reference mirroring the kernel's mixed precision (bf16 in, f32 acc)."""
    cdt = compute_dtype
    h1 = jnp.dot(x.astype(cdt), p["w1"].astype(cdt).T,
                 preferred_element_type=jnp.float32) + p["b1"].T
    h1 = jnp.maximum(h1, 0.0)
    h2 = jnp.dot(h1.astype(cdt), p["w2"].astype(cdt).T,
                 preferred_element_type=jnp.float32) + p["b2"].T
    h2 = jnp.maximum(h2, 0.0)
    return jnp.dot(h2.astype(cdt), p["w3"].astype(cdt).T,
                   preferred_element_type=jnp.float32) + p["b3"].T


if __name__ == "__main__":
    key = jax.random.PRNGKey(0)
    kp, kx = jax.random.split(key)
    params = init_params(kp)

    batch = 8
    x = jax.random.normal(kx, (batch, INPUT_SIZE), jnp.float32)

    out = dqn_forward(x, params)
    out = jax.block_until_ready(out)

    ref = reference_forward(x, params)
    assert out.shape == (batch, OUTPUT_SIZE)
    assert jnp.allclose(out, ref, atol=1e-3, rtol=1e-3), "mismatch vs pure-JAX reference"

    print("KERNEL_OK")
</pallas_src>

<mosaic_0001>
module attributes {stable_mosaic.version = 11 : i64} {
  func.func @dqn_mlp_kernel(%arg0: i32, %arg1: memref<11x128xbf16, #tpu.memory_space<vmem>>, %arg2: memref<32x11xbf16, #tpu.memory_space<vmem>>, %arg3: memref<32x1xf32, #tpu.memory_space<vmem>>, %arg4: memref<64x32xbf16, #tpu.memory_space<vmem>>, %arg5: memref<64x1xf32, #tpu.memory_space<vmem>>, %arg6: memref<6x64xbf16, #tpu.memory_space<vmem>>, %arg7: memref<6x1xf32, #tpu.memory_space<vmem>>, %arg8: memref<6x128xf32, #tpu.memory_space<vmem>>) attributes {dimension_semantics = [#tpu.dimension_semantics<parallel>], iteration_bounds = array<i64: 1>, scalar_prefetch = 0 : i64, scratch_operands = 0 : i64, tpu.core_type = #tpu.core_type<tc>, window_params = [{transform_indices = @transform_0, window_bounds = array<i64: 11, 128>}, {pipeline_mode = #tpu.pipeline_mode<synchronous>, transform_indices = @transform_1, window_bounds = array<i64: 32, 11>}, {pipeline_mode = #tpu.pipeline_mode<synchronous>, transform_indices = @transform_2, window_bounds = array<i64: 32, 1>}, {pipeline_mode = #tpu.pipeline_mode<synchronous>, transform_indices = @transform_3, window_bounds = array<i64: 64, 32>}, {pipeline_mode = #tpu.pipeline_mode<synchronous>, transform_indices = @transform_4, window_bounds = array<i64: 64, 1>}, {pipeline_mode = #tpu.pipeline_mode<synchronous>, transform_indices = @transform_5, window_bounds = array<i64: 6, 64>}, {pipeline_mode = #tpu.pipeline_mode<synchronous>, transform_indices = @transform_6, window_bounds = array<i64: 6, 1>}, {transform_indices = @transform_7, window_bounds = array<i64: 6, 128>}]} {
    %c0 = arith.constant 0 : index
    %c0_0 = arith.constant 0 : index
    %0 = vector.load %arg1[%c0, %c0_0] : memref<11x128xbf16, #tpu.memory_space<vmem>>, vector<11x128xbf16>
    %c0_1 = arith.constant 0 : index
    %c0_2 = arith.constant 0 : index
    %1 = vector.load %arg2[%c0_1, %c0_2] : memref<32x11xbf16, #tpu.memory_space<vmem>>, vector<32x11xbf16>
    %cst = arith.constant dense<0.000000e+00> : vector<32x128xf32>
    %2 = tpu.matmul %1, %0, %cst {dimension_numbers = #tpu.dot_dimension_numbers<[1], [0], [0], [1], [0, 0, 1, 1], [], []>} : vector<32x11xbf16>, vector<11x128xbf16>, vector<32x128xf32> -> vector<32x128xf32>
    %c0_3 = arith.constant 0 : index
    %c0_4 = arith.constant 0 : index
    %3 = vector.load %arg3[%c0_3, %c0_4] : memref<32x1xf32, #tpu.memory_space<vmem>>, vector<32x1xf32>
    %4 = vector.broadcast %3 : vector<32x1xf32> to vector<32x128xf32>
    %5 = arith.addf %2, %4 : vector<32x128xf32>
    %cst_5 = arith.constant 0.000000e+00 : f32
    %6 = vector.broadcast %cst_5 : f32 to vector<32x128xf32>
    %7 = arith.maximumf %5, %6 : vector<32x128xf32>
    %c0_6 = arith.constant 0 : index
    %c0_7 = arith.constant 0 : index
    %8 = vector.load %arg4[%c0_6, %c0_7] : memref<64x32xbf16, #tpu.memory_space<vmem>>, vector<64x32xbf16>
    %9 = arith.truncf %7 : vector<32x128xf32> to vector<32x128xbf16>
    %cst_8 = arith.constant dense<0.000000e+00> : vector<64x128xf32>
    %10 = tpu.matmul %8, %9, %cst_8 {dimension_numbers = #tpu.dot_dimension_numbers<[1], [0], [0], [1], [0, 0, 1, 1], [], []>} : vector<64x32xbf16>, vector<32x128xbf16>, vector<64x128xf32> -> vector<64x128xf32>
    %c0_9 = arith.constant 0 : index
    %c0_10 = arith.constant 0 : index
    %11 = vector.load %arg5[%c0_9, %c0_10] : memref<64x1xf32, #tpu.memory_space<vmem>>, vector<64x1xf32>
    %12 = vector.broadcast %11 : vector<64x1xf32> to vector<64x128xf32>
    %13 = arith.addf %10, %12 : vector<64x128xf32>
    %cst_11 = arith.constant 0.000000e+00 : f32
    %14 = vector.broadcast %cst_11 : f32 to vector<64x128xf32>
    %15 = arith.maximumf %13, %14 : vector<64x128xf32>
    %c0_12 = arith.constant 0 : index
    %c0_13 = arith.constant 0 : index
    %16 = vector.load %arg6[%c0_12, %c0_13] : memref<6x64xbf16, #tpu.memory_space<vmem>>, vector<6x64xbf16>
    %17 = arith.truncf %15 : vector<64x128xf32> to vector<64x128xbf16>
    %cst_14 = arith.constant dense<0.000000e+00> : vector<6x128xf32>
    %18 = tpu.matmul %16, %17, %cst_14 {dimension_numbers = #tpu.dot_dimension_numbers<[1], [0], [0], [1], [0, 0, 1, 1], [], []>} : vector<6x64xbf16>, vector<64x128xbf16>, vector<6x128xf32> -> vector<6x128xf32>
    %c0_15 = arith.constant 0 : index
    %c0_16 = arith.constant 0 : index
    %19 = vector.load %arg7[%c0_15, %c0_16] : memref<6x1xf32, #tpu.memory_space<vmem>>, vector<6x1xf32>
    %20 = vector.broadcast %19 : vector<6x1xf32> to vector<6x128xf32>
    %21 = arith.addf %18, %20 : vector<6x128xf32>
    %c0_17 = arith.constant 0 : index
    %c0_18 = arith.constant 0 : index
    %22 = vector.load %arg8[%c0_17, %c0_18] : memref<6x128xf32, #tpu.memory_space<vmem>>, vector<6x128xf32>
    tpu.vector_store %arg8[%c0_17, %c0_18], %21 {strides = array<i32>} : memref<6x128xf32, #tpu.memory_space<vmem>>, vector<6x128xf32>,
    return
  }
  func.func @transform_0(%arg0: i32) -> (i32, i32) {
    %c0_i32 = arith.constant 0 : i32
    %c0_i32_0 = arith.constant 0 : i32
    return %c0_i32, %arg0 : i32, i32
  }
  func.func @transform_1(%arg0: i32) -> (i32, i32) {
    %c0_i32 = arith.constant 0 : i32
    %c0_i32_0 = arith.constant 0 : i32
    %c0_i32_1 = arith.constant 0 : i32
    return %c0_i32, %c0_i32_0 : i32, i32
  }
  func.func @transform_2(%arg0: i32) -> (i32, i32) {
    %c0_i32 = arith.constant 0 : i32
    %c0_i32_0 = arith.constant 0 : i32
    %c0_i32_1 = arith.constant 0 : i32
    return %c0_i32, %c0_i32_0 : i32, i32
  }
  func.func @transform_3(%arg0: i32) -> (i32, i32) {
    %c0_i32 = arith.constant 0 : i32
    %c0_i32_0 = arith.constant 0 : i32
    %c0_i32_1 = arith.constant 0 : i32
    return %c0_i32, %c0_i32_0 : i32, i32
  }
  func.func @transform_4(%arg0: i32) -> (i32, i32) {
    %c0_i32 = arith.constant 0 : i32
    %c0_i32_0 = arith.constant 0 : i32
    %c0_i32_1 = arith.constant 0 : i32
    return %c0_i32, %c0_i32_0 : i32, i32
  }
  func.func @transform_5(%arg0: i32) -> (i32, i32) {
    %c0_i32 = arith.constant 0 : i32
    %c0_i32_0 = arith.constant 0 : i32
    %c0_i32_1 = arith.constant 0 : i32
    return %c0_i32, %c0_i32_0 : i32, i32
  }
  func.func @transform_6(%arg0: i32) -> (i32, i32) {
    %c0_i32 = arith.constant 0 : i32
    %c0_i32_0 = arith.constant 0 : i32
    %c0_i32_1 = arith.constant 0 : i32
    return %c0_i32, %c0_i32_0 : i32, i32
  }
  func.func @transform_7(%arg0: i32) -> (i32, i32) {
    %c0_i32 = arith.constant 0 : i32
    %c0_i32_0 = arith.constant 0 : i32
    return %c0_i32, %arg0 : i32, i32
  }
}

</mosaic_0001>

<bundles_post_ra>
// kernel: tpu_custom_call.1
= control target key start
LH: loop header
LB: loop body
LE: loop exit
PB: predicated region body
PF: predicated region fallthrough
CT: control target
= control target key end

     0   :  { %vm80_vm0 = vcmask 1044480   ;;  %vm81_vm1 = vcmask 1045504   ;;  %v468_v2 = vmov 65535   ;;  %vm73_vm2 = vcmask 89088   ;;  %s585_s0 = inlined_call_operand.vmem [shape: bf16[11,128], index: 0, kind: input, shape index: {}]   ;;  %s586_s1 = inlined_call_operand.vmem [shape: bf16[32,11], index: 1, kind: input, shape index: {}]   ;;  %s587_s2 = inlined_call_operand.vmem [shape: f32[32,1], index: 2, kind: input, shape index: {}]   ;;  %s588_s3 = inlined_call_operand.vmem [shape: bf16[64,32], index: 3, kind: input, shape index: {}]   ;;  %s589_s4 = inlined_call_operand.vmem [shape: f32[64,1], index: 4, kind: input, shape index: {}]   ;;  %s590_s5 = inlined_call_operand.vmem [shape: bf16[6,64], index: 5, kind: input, shape index: {}]   ;;  %s591_s6 = inlined_call_operand.vmem [shape: f32[6,1], index: 6, kind: input, shape index: {}]   ;;  %s592_s7 = inlined_call_operand.hbm [shape: f32[6,128], index: 7, kind: output, shape index: {}]  }
   0x1   :  { %v439_v0 = vld [vmem:[%s585_s0] sm:$0x3f]   ;;  %v82_v3 = vsel %vm80_vm0, 4294967295, %v468_v2  ;;  %v36_v5 = vld [vmem:[%s587_s2 + $0x10] sm:$0xff]  ;;  %v469_v7 = vmov 0   ;;  %v441_v9 = vld [vmem:[%s586_s1 + $0x8] sm:$0xff]  }
   0x2   :  { %v440_v1 = vld [vmem:[%s586_s1] sm:$0xff]   ;;  %v83_v4 = vsel %vm81_vm1, %v82_v3, 0  ;;  %437 = vset.pattern.permute.xlu0 %v469_v7  ;;  %438 = vset.pattern.permute.xlu1 %v469_v7  ;;  %v37_v10 = vld [vmem:[%s587_s2 + $0x18] sm:$0xff]  ;;  %v35_v11 = vld [vmem:[%s587_s2 + $0x8] sm:$0xff] }
   0x3   :  { %404 = vmatprep.mubr.msk.bf16.mxu0 %vm73_vm2, %v440_v1  ;;  %v85_v6 = vand.u32 %v439_v0, %v83_v4  ;;  %v34_v8 = vld [vmem:[%s587_s2] sm:$0xff]  ;;  %50 = vperm.xlu0 %437, %v36_v5   ;;  %v156_v12 = vld [vmem:[%s589_s4 + $0x30] sm:$0xff]  ;;  %v157_v13 = vld [vmem:[%s589_s4 + $0x38] sm:$0xff] }
   0x4   :  { %40 = vperm.xlu1 %438, %v34_v8  }
   0x5   :  { %402 = vmatprep.subr.bf16.mxu0 %v85_v6 }
   0x6   :  { %403 = vmatpush3.bf16.msra.mxu0 %v85_v6 }
   0x7   :  { %55 = vperm.xlu0 %437, %v37_v10  }
   0x8   :  { %45 = vperm.xlu1 %438, %v35_v11  }
   0x9   :  { %405 = vmatmul.mubr.msk.bf16.vlgmr.msra.gmra.mxu0 %vm73_vm2, %v441_v9 }
   0xa   :  { %12 = vsyncpa [#allocation3], 0  ;;  %v154_v14 = vld [vmem:[%s589_s4 + $0x20] sm:$0xff]  ;;  %v155_v15 = vld [vmem:[%s589_s4 + $0x28] sm:$0xff]  ;;  %vm218_vm3 = vcmask 261120   ;;  %v470_v43 = vmov 0.0  }
   0xb   :  { %190 = vperm.xlu0 %437, %v156_v12   ;;  %v152_v16 = vld [vmem:[%s589_s4 + $0x10] sm:$0xff]  ;;  %v153_v17 = vld [vmem:[%s589_s4 + $0x18] sm:$0xff]  ;;  %v150_v18 = vld [vmem:[%s589_s4] sm:$0xff]  ;;  %420 = vmatprep.subr.bf16.mxu0 %v470_v43  ;;  %vm471_vm4 = vmmov 0   ;;  %vm315_vm5 = vcmask 523264   ;;  %s472_s13 = smov [#allocation2]  }
   0xc   :  { %195 = vperm.xlu1 %438, %v157_v13   ;;  %v151_v19 = vld [vmem:[%s589_s4 + $0x8] sm:$0xff]  ;;  %v309_v20 = vld [vmem:[%s591_s6] sm:$0x3f]  ;;  %v444_v41 = vld [vmem:[%s588_s3 + $0x10] sm:$0xff]   ;;  %428 = vmatprep.mubr.msk.bf16.mxu0 %vm471_vm4, %v470_v43  ;;  %s366_s14 = sshll.u32 %s472_s13, 4  ;;  %s367_s14 = int_to_ptr.vmem [resolvable:$true] %s366_s14 }
   0xd   :  { %v442_v21 = vld [vmem:[%s588_s3] sm:$0xff]   ;;  %v443_v40 = vld [vmem:[%s588_s3 + $0x8] sm:$0xff]   ;;  %v445_v42 = vld [vmem:[%s588_s3 + $0x18] sm:$0xff]   ;;  %s446_s15 = scalar_lea.vmem %s367_s14, 128  ;;  %p451_p1 = scmp.lt.s32.totalorder %s367_s14, %s367_s14 }
   0xe   :  { %412 = vmatprep.mubr.msk.bf16.mxu1 %vm218_vm3, %v442_v21  ;;  %p447_p0 = scmp.ne.s32.totalorder %s367_s14, %s446_s15  ;;  %p452_p2 = scmp.lt.s32.totalorder %s446_s15, %s446_s15 }
   0xf   :  { %180 = vperm.xlu0 %437, %v154_v14  }
  0x10   :  { %185 = vperm.xlu1 %438, %v155_v15   ;;  %p453_p3 = por %p452_p2, %p451_p1 }
  0x12   :  { %p454_p4 = pnand %p453_p3, %p447_p0 }
  0x13   :  { %170 = vperm.xlu0 %437, %v152_v16   ;;  %v304_v16 = vld [vmem:[%s590_s5] sm:$0x7] }
  0x14   :  { %175 = vperm.xlu1 %438, %v153_v17  }
  0x17   :  { %160 = vperm.xlu0 %437, %v150_v18  }
  0x18   :  { %165 = vperm.xlu1 %438, %v151_v19  }
  0x1b   :  { %312 = vperm.xlu0 %437, %v309_v20  }
  0x7e   :  { %v51_v22 = vpop.permute.xlu0 %50 }
  0x7f   :  { %v41_v23 = vpop.permute.xlu1 %40 }
  0x82   :  { %v56_v27 = vpop.permute.xlu0 %55 }
  0x83   :  { %v46_v31 = vpop.permute.xlu1 %45 }
  0x86   :  { %v191_v47 = vpop.permute.xlu0 %190 }
  0x87   :  { %v196_v45 = vpop.permute.xlu1 %195 }
  0x8a   :  { %v181_v52 = vpop.permute.xlu0 %180 }
  0x8b   :  { %v186_v50 = vpop.permute.xlu1 %185 }
  0x8e   :  { %v171_v63 = vpop.permute.xlu0 %170 }
  0x8f   :  { %v176_v57 = vpop.permute.xlu1 %175 }
  0x92   :  { %v161_v9 = vpop.permute.xlu0 %160 }
  0x93   :  { %v166_v5 = vpop.permute.xlu1 %165 }
  0x96   :  { %v313_v17 = vpop.permute.xlu0 %312 }
  0xc9   :  { %v406_v24 = vpop.f32.mrf.mxu0 }
  0xca   :  { %v130_v26 = vadd.f32 %v406_v24, %v51_v22 }
  0xcb   :  { %v121_v25 = vpop.f32.mrf.mxu0 }
  0xcc   :  { %v122_v29 = vadd.f32 %v121_v25, %v41_v23  ;;  %v138_v33 = vmax.f32 %v130_v26, 0.0 }
  0xcd   :  { %v407_v28 = vpop.f32.mrf.mxu0 }
  0xce   :  { %v133_v30 = vadd.f32 %v407_v28, %v56_v27  ;;  %v136_v36 = vmax.f32 %v122_v29, 0.0 }
  0xcf   :  { %v124_v32 = vpop.f32.mrf.mxu0 }
  0xd0   :  { %v139_v34 = vmax.f32 %v133_v30, 0.0  ;;  %v125_v35 = vadd.f32 %v124_v32, %v46_v31 }
  0xd2   :  { %v137_v37 = vmax.f32 %v125_v35, 0.0  ;;  %v149_v38 = vpack.c.bf16 %v139_v34, %v138_v33 }
  0xd4   :  { %v148_v39 = vpack.c.bf16 %v137_v37, %v136_v36  ;;  %408 = vmatprep.subr.bf16.mxu1 %v149_v38 }
  0xd5   :  { %409 = vmatpush3.bf16.msra.mxu1 %v149_v38 }
  0xd6   :  { %410 = vmatprep.subr.bf16.mxu1 %v148_v39 }
  0xd9   :  { %411 = vmatpush3.bf16.msra.mxu1 %v148_v39 }
  0xdc   :  { %413 = vmatmul.mubr.msk.bf16.vlgmr.msra.gmra.mxu1 %vm218_vm3, %v443_v40 }
  0xdd   :  { %416 = vmatprep.mubr.msk.bf16.mxu1 %vm218_vm3, %v444_v41 }
  0xe4   :  { %417 = vmatmul.mubr.msk.bf16.gmra.mxu1 %vm218_vm3, %v445_v42 }
 0x19c   :  { %v414_v44 = vpop.f32.mrf.mxu1 }
 0x19d   :  { %v274_v3 = vadd.f32 %v414_v44, %v171_v63 }
 0x19e   :  { %v265_v46 = vpop.f32.mrf.mxu1 }
 0x19f   :  { %v298_v10 = vmax.f32 %v274_v3, 0.0  ;;  %v266_v11 = vadd.f32 %v265_v46, %v161_v9 }
 0x1a0   :  { %v415_v48 = vpop.f32.mrf.mxu1 }
 0x1a1   :  { %v277_v0 = vadd.f32 %v415_v48, %v176_v57  ;;  %v296_v14 = vmax.f32 %v266_v11, 0.0 }
 0x1a2   :  { %v268_v49 = vpop.f32.mrf.mxu1 }
 0x1a3   :  { %v299_v6 = vmax.f32 %v277_v0, 0.0  ;;  %v269_v7 = vadd.f32 %v268_v49, %v166_v5 }
 0x1a4   :  { %v418_v51 = vpop.f32.mrf.mxu1 }
 0x1a5   :  { %v290_v54 = vadd.f32 %v418_v51, %v191_v47  ;;  %v306_v12 = vpack.c.bf16 %v299_v6, %v298_v10  ;;  %v297_v13 = vmax.f32 %v269_v7, 0.0 }
 0x1a6   :  { %v281_v53 = vpop.f32.mrf.mxu1 }
 0x1a7   :  { %v302_v59 = vmax.f32 %v290_v54, 0.0  ;;  %v282_v60 = vadd.f32 %v281_v53, %v181_v52  ;;  %v305_v15 = vpack.c.bf16 %v297_v13, %v296_v14 }
 0x1a8   :  { %v419_v55 = vpop.f32.mrf.mxu1 }
 0x1a9   :  { %v293_v56 = vadd.f32 %v419_v55, %v196_v45  ;;  %v300_v4 = vmax.f32 %v282_v60, 0.0 }
 0x1aa   :  { %v284_v58 = vpop.f32.mrf.mxu1 }
 0x1ab   :  { %v303_v61 = vmax.f32 %v293_v56, 0.0  ;;  %v285_v62 = vadd.f32 %v284_v58, %v186_v50 }
 0x1ad   :  { %v308_v1 = vpack.c.bf16 %v303_v61, %v302_v59  ;;  %v301_v2 = vmax.f32 %v285_v62, 0.0 }
 0x1af   :  { %421 = vmatpush3.bf16.msra.mxu0 %v308_v1  ;;  %v307_v8 = vpack.c.bf16 %v301_v2, %v300_v4 }
 0x1b0   :  { %422 = vmatprep.subr.bf16.mxu0 %v470_v43 }
 0x1b3   :  { %423 = vmatpush3.bf16.msra.mxu0 %v307_v8 }
 0x1b4   :  { %424 = vmatprep.subr.bf16.mxu0 %v470_v43 }
 0x1b7   :  { %425 = vmatpush3.bf16.msra.mxu0 %v306_v12 }
 0x1b8   :  { %426 = vmatprep.subr.bf16.mxu0 %v470_v43 }
 0x1bb   :  { %427 = vmatpush3.bf16.msra.mxu0 %v305_v15 }
 0x1be   :  { %429 = vmatmul.mubr.msk.bf16.vlgmr.msra.gmra.mxu0 %vm315_vm5, %v304_v16 }
 0x27e   :  { %v353_v18 = vpop.f32.mrf.mxu0 }
 0x27f   :  { %v354_v19 = vadd.f32 %v353_v18, %v313_v17 }
 0x280   :  { %v430_v20 = vpop.f32.mrf.mxu0 }
 0x281   :  { %359 = vst [vmem:[#allocation2] sm:$0x3f] %v354_v19 }
 0x282   :  { %v356_v21 = vpop.f32.mrf.mxu0 }
 0x283   :  { %457 = shalt.err (!%p454_p4)
}
 0x284   :  { %369 = dma.vmem_to_hbm [thread:$0]  %s367_s14, 128, %s592_s7, [#allocation3]   ;;  %v431_v22 = vpop.f32.mrf.mxu0 }
 0x285   :  { %466 = dma.done.wait [#allocation3], 128  }
 0x286   :  { %467 = vsyncadd [#allocation3], 4294967168 }
 0x287   :  { %373 = vsyncpa [#allocation3], 1 }

</bundles_post_ra>
